<compile_context>
chip_gen: v5e
topology: v5e:2x2
jax: 0.10.0
libtpu: 0.0.40
codegen_flags: <defaults>
</compile_context>

<pallas_src>
import math

import jax
import jax.numpy as jnp
from jax.experimental import pallas as pl
from jax.experimental.pallas import tpu as pltpu


def _ppp_uniform_kernel(table_ref, idx_ref, out_ref):
    # table_ref: (C,)      f32 in SMEM — class_dist_log + box_log_probs + log(ppp_rate), pre-folded
    # idx_ref:   (TR, TC)  i32 in VMEM — class indices, lane-dense tile
    # out_ref:   (TR, TC)  f32 in VMEM
    idx = idx_ref[...]
    C = table_ref.shape[0]
    result = jnp.zeros(idx.shape, jnp.float32)
    # Small-C gather: one VPU compare/select per class, table scalars read from SMEM.
    # (For large C this should become an MXU one-hot dot or a DMA gather instead.)
    for c in range(C):
        result = jnp.where(idx == c, table_ref[c], result)
    out_ref[...] = result


def poisson_point_process_uniform_forward(
    src, class_dist_log, ppp_rate, image_size, *, cols=1024, max_tile_rows=512
):
    """src: (..., D) f32 (class index in last channel), class_dist_log: (C,) f32,
    ppp_rate: scalar, image_size: (2,) f32. Returns log-probs of shape src.shape[:-1]."""
    lead = src.shape[:-1]
    D = src.shape[-1]
    C = class_dist_log.shape[0]

    # (1) Lane-dense int32 index array — the kernel only reads 1/D of src's bytes.
    idx = src[..., D - 1].astype(jnp.int32)
    # Clamp malformed indices into range (PyTorch advanced indexing would error here).
    idx = jnp.clip(idx, 0, C - 1)

    # (2) Fold every scalar log term into the class table host-side.
    box_log_probs = jnp.sum(-jnp.log(image_size.astype(jnp.float32)) * 2.0 + math.log(2.0))
    rate_log = jnp.log(jnp.asarray(ppp_rate, jnp.float32))
    table = (class_dist_log.astype(jnp.float32) + box_log_probs + rate_log).reshape(C)

    # (3) Flatten + pad to a lane-dense (rows, cols) slab, cols a multiple of 128.
    M = int(idx.size)
    flat = idx.reshape(-1)
    rows_needed = max(1, -(-M // cols))
    tile_rows = min(max_tile_rows, 8 * (-(-rows_needed // 8)))
    rows = tile_rows * (-(-rows_needed // tile_rows))
    pad = rows * cols - M
    if pad:
        # Pad with a valid class index (0); padded outputs are sliced off below.
        flat = jnp.concatenate([flat, jnp.zeros((pad,), jnp.int32)])
    idx2d = flat.reshape(rows, cols)

    grid = (rows // tile_rows,)
    out2d = pl.pallas_call(
        _ppp_uniform_kernel,
        out_shape=jax.ShapeDtypeStruct((rows, cols), jnp.float32),
        grid_spec=pltpu.PrefetchScalarGridSpec(
            num_scalar_prefetch=0,
            grid=grid,
            in_specs=[
                # Folded class table: tiny, kept resident in SMEM across the grid.
                pl.BlockSpec((C,), lambda i: (0,), memory_space=pltpu.MemorySpace.SMEM),
                # Index tiles: lane-dense, auto double-buffered by the BlockSpec pipeline.
                pl.BlockSpec((tile_rows, cols), lambda i: (i, 0)),
            ],
            out_specs=pl.BlockSpec((tile_rows, cols), lambda i: (i, 0)),
        ),
        compiler_params=pltpu.CompilerParams(
            # Independent tiles: lets the runtime shard grid steps across both v7x cores.
            dimension_semantics=("parallel",),
        ),
    )(table, idx2d)

    return out2d.reshape(-1)[:M].reshape(lead)


def _reference_forward(src, class_dist_log, ppp_rate, image_size):
    idx = src[..., -1].astype(jnp.int32)
    cls_log_probs = class_dist_log[idx]
    box_log_probs = jnp.sum(-jnp.log(image_size) * 2.0 + math.log(2.0))
    return cls_log_probs + box_log_probs + jnp.log(jnp.asarray(ppp_rate, jnp.float32))


if __name__ == "__main__":
    key = jax.random.PRNGKey(0)
    k_box, k_cls = jax.random.split(key)

    B, N, C = 2, 8, 4            # batch, num detections, num classes
    D = 5                        # 4 box coords + 1 class index

    # Deterministic "parameters" (module __init__ args), built in-script.
    class_logits = jnp.arange(C, dtype=jnp.float32) * 0.5 - 1.0
    class_dist_log = jax.nn.log_softmax(class_logits)       # (C,) log class distribution
    ppp_rate = 0.3                                           # Poisson point process rate
    image_size = jnp.array([480.0, 640.0], jnp.float32)      # image_sizes[0]

    # Deterministic example input src: boxes + class index in the last channel.
    boxes = jax.random.uniform(k_box, (B, N, 4), jnp.float32) * 100.0
    cls_idx = jax.random.randint(k_cls, (B, N, 1), 0, C).astype(jnp.float32)
    src = jnp.concatenate([boxes, cls_idx], axis=-1)         # (B, N, D)

    out = poisson_point_process_uniform_forward(src, class_dist_log, ppp_rate, image_size)
    out = jax.block_until_ready(out)

    ref = _reference_forward(src, class_dist_log, ppp_rate, image_size)
    assert out.shape == (B, N)
    assert jnp.allclose(out, ref, atol=1e-5, rtol=1e-5), (out, ref)

    print("KERNEL_OK")
</pallas_src>

<mosaic_0001>
module attributes {stable_mosaic.version = 11 : i64} {
  func.func @_ppp_uniform_kernel(%arg0: i32, %arg1: memref<4xf32, #tpu.memory_space<smem>>, %arg2: memref<8x1024xi32, #tpu.memory_space<vmem>>, %arg3: memref<8x1024xf32, #tpu.memory_space<vmem>>) attributes {dimension_semantics = [#tpu.dimension_semantics<parallel>], iteration_bounds = array<i64: 1>, scalar_prefetch = 0 : i64, scratch_operands = 0 : i64, tpu.core_type = #tpu.core_type<tc>, window_params = [{transform_indices = @transform_0, window_bounds = array<i64: 4>}, {transform_indices = @transform_1, window_bounds = array<i64: 8, 1024>}, {transform_indices = @transform_2, window_bounds = array<i64: 8, 1024>}]} {
    %c0 = arith.constant 0 : index
    %c0_0 = arith.constant 0 : index
    %0 = vector.load %arg2[%c0, %c0_0] : memref<8x1024xi32, #tpu.memory_space<vmem>>, vector<8x1024xi32>
    %cst = arith.constant 0.000000e+00 : f32
    %1 = vector.broadcast %cst : f32 to vector<8x1024xf32>
    %c0_i32 = arith.constant 0 : i32
    %2 = vector.broadcast %c0_i32 : i32 to vector<8x1024xi32>
    %3 = arith.cmpi eq, %0, %2 : vector<8x1024xi32>
    %c0_1 = arith.constant 0 : index
    %4 = memref.load %arg1[%c0_1] : memref<4xf32, #tpu.memory_space<smem>>
    %5 = vector.broadcast %4 : f32 to vector<8x1024xf32>
    %6 = arith.select %3, %5, %1 : vector<8x1024xi1>, vector<8x1024xf32>
    %c1_i32 = arith.constant 1 : i32
    %7 = vector.broadcast %c1_i32 : i32 to vector<8x1024xi32>
    %8 = arith.cmpi eq, %0, %7 : vector<8x1024xi32>
    %c1 = arith.constant 1 : index
    %9 = memref.load %arg1[%c1] : memref<4xf32, #tpu.memory_space<smem>>
    %10 = vector.broadcast %9 : f32 to vector<8x1024xf32>
    %11 = arith.select %8, %10, %6 : vector<8x1024xi1>, vector<8x1024xf32>
    %c2_i32 = arith.constant 2 : i32
    %12 = vector.broadcast %c2_i32 : i32 to vector<8x1024xi32>
    %13 = arith.cmpi eq, %0, %12 : vector<8x1024xi32>
    %c2 = arith.constant 2 : index
    %14 = memref.load %arg1[%c2] : memref<4xf32, #tpu.memory_space<smem>>
    %15 = vector.broadcast %14 : f32 to vector<8x1024xf32>
    %16 = arith.select %13, %15, %11 : vector<8x1024xi1>, vector<8x1024xf32>
    %c3_i32 = arith.constant 3 : i32
    %17 = vector.broadcast %c3_i32 : i32 to vector<8x1024xi32>
    %18 = arith.cmpi eq, %0, %17 : vector<8x1024xi32>
    %c3 = arith.constant 3 : index
    %19 = memref.load %arg1[%c3] : memref<4xf32, #tpu.memory_space<smem>>
    %20 = vector.broadcast %19 : f32 to vector<8x1024xf32>
    %21 = arith.select %18, %20, %16 : vector<8x1024xi1>, vector<8x1024xf32>
    %c0_2 = arith.constant 0 : index
    %c0_3 = arith.constant 0 : index
    %22 = vector.load %arg3[%c0_2, %c0_3] : memref<8x1024xf32, #tpu.memory_space<vmem>>, vector<8x1024xf32>
    tpu.vector_store %arg3[%c0_2, %c0_3], %21 {strides = array<i32>} : memref<8x1024xf32, #tpu.memory_space<vmem>>, vector<8x1024xf32>,
    return
  }
  func.func @transform_0(%arg0: i32) -> i32 {
    %c0_i32 = arith.constant 0 : i32
    %c0_i32_0 = arith.constant 0 : i32
    return %c0_i32 : i32
  }
  func.func @transform_1(%arg0: i32) -> (i32, i32) {
    %c0_i32 = arith.constant 0 : i32
    %c0_i32_0 = arith.constant 0 : i32
    return %arg0, %c0_i32 : i32, i32
  }
  func.func @transform_2(%arg0: i32) -> (i32, i32) {
    %c0_i32 = arith.constant 0 : i32
    %c0_i32_0 = arith.constant 0 : i32
    return %arg0, %c0_i32 : i32, i32
  }
}

</mosaic_0001>

<bundles_post_ra>
// kernel: tpu_custom_call.1
= control target key start
LH: loop header
LB: loop body
LE: loop exit
PB: predicated region body
PF: predicated region fallthrough
CT: control target
= control target key end

     0   :  { %7 = vsyncpa [#allocation5], 0  ;;  %s263_s0 = inlined_call_operand.hbm [shape: f32[4], index: 0, kind: input, shape index: {}]   ;;  %s264_s1 = inlined_call_operand.hbm [shape: s32[8,1024], index: 1, kind: input, shape index: {}]   ;;  %s265_s2 = inlined_call_operand.hbm [shape: f32[8,1024], index: 2, kind: output, shape index: {}]  }
   0x1   :  { %8 = vsyncpa [#allocation3], 0 }
   0x2   :  { %9 = vsyncpa [#allocation4], 0  ;;  %s15_s11 = sshll.u32 %s263_s0, 4  ;;  %s24_s14 = sshll.u32 %s264_s1, 4  ;;  %s16_s11 = int_to_ptr.hbm [resolvable:$true] %s15_s11  ;;  %s25_s14 = int_to_ptr.hbm [resolvable:$true] %s24_s14 }
   0x3   :  { %s217_s15 = smov [#allocation2]   ;;  %s218_s16 = smov [#allocation6]  }
   0x4   :  { %18 = dma.hbm_to_smem %s16_s11, 16, %s217_s15, [#allocation5]  }
   0x5   :  { %s26_s17 = sshll.u32 %s218_s16, 4  ;;  %s27_s17 = int_to_ptr.vmem [resolvable:$true] %s26_s17 }
   0x6   :  { %29 = dma.hbm_to_vmem [thread:$0]  %s25_s14, 1024, %s27_s17, [#allocation3]  }
   0x7   :  { %211 = dma.done.wait [#allocation5], 16  }
   0x8   :  { %212 = vsyncadd [#allocation5], 4294967280 }
   0x9   :  { %213 = dma.done.wait [#allocation3], 1024  }
   0xa   :  { %214 = vsyncadd [#allocation3], 4294966272 }
   0xb   :  { %38 = sfence }
   0xc   :  { %v39_v0 = vld [vmem:[#allocation6] sm:$0xff]  ;;  %s55_s18 = sld [smem:[#allocation2]]  ;;  %v40_v1 = vld [vmem:[#allocation6 + $0x8] sm:$0xff]  ;;  %v41_v2 = vld [vmem:[#allocation6 + $0x10] sm:$0xff]  ;;  %s219_s20 = smov [#allocation7]  }
   0xd   :  { %s145_s0 = sld [smem:[#allocation2 + $0x1]]  ;;  %vm48_vm4 = vcmp.eq.s32.totalorder %v40_v1, 0  ;;  %vm66_vm5 = vcmp.eq.s32.totalorder %v40_v1, 1  ;;  %vm84_vm6 = vcmp.eq.s32.totalorder %v40_v1, 2  ;;  %vm49_vm8 = vcmp.eq.s32.totalorder %v41_v2, 0  ;;  %v42_v3 = vld [vmem:[#allocation6 + $0x18] sm:$0xff] }
   0xe   :  { %s146_s1 = sld [smem:[#allocation2 + $0x2]]  ;;  %vm67_vm9 = vcmp.eq.s32.totalorder %v41_v2, 1  ;;  %vm85_vm10 = vcmp.eq.s32.totalorder %v41_v2, 2  ;;  %vm103_vm11 = vcmp.eq.s32.totalorder %v41_v2, 3  ;;  %v43_v4 = vld [vmem:[#allocation6 + $0x20] sm:$0xff]  ;;  %vm50_vm12 = vcmp.eq.s32.totalorder %v42_v3, 0 }
   0xf   :  { %s147_s19 = sld [smem:[#allocation2 + $0x3]]  ;;  %vm68_vm13 = vcmp.eq.s32.totalorder %v42_v3, 1  ;;  %vm86_vm14 = vcmp.eq.s32.totalorder %v42_v3, 2  ;;  %vm51_vm1 = vcmp.eq.s32.totalorder %v43_v4, 0  ;;  %vm69_vm2 = vcmp.eq.s32.totalorder %v43_v4, 1  ;;  %v44_v14 = vld [vmem:[#allocation6 + $0x28] sm:$0xff] }
  0x10   :  { %vm87_vm0 = vcmp.eq.s32.totalorder %v43_v4, 2  ;;  %vm266_vm3 = vcmp.eq.s32.totalorder %v39_v0, 0  ;;  %vm267_vm7 = vcmp.eq.s32.totalorder %v39_v0, 1  ;;  %vm268_vm15 = vcmp.eq.s32.totalorder %v39_v0, 2  ;;  %v45_v25 = vld [vmem:[#allocation6 + $0x30] sm:$0xff]  ;;  %v46_v32 = vld [vmem:[#allocation6 + $0x38] sm:$0xff] }
  0x11   :  { %s132_s21 = sshll.u32 %s219_s20, 4  ;;  %s134_s24 = sshll.u32 %s265_s2, 4  ;;  %s133_s21 = int_to_ptr.vmem [resolvable:$true] %s132_s21  ;;  %s135_s24 = int_to_ptr.hbm [resolvable:$true] %s134_s24 }
  0x12   :  { %v56_v5 = vstv %s55_s18 }
  0x13   :  { %v57_v6 = vsel %vm266_vm3, %v56_v5, 0.0  ;;  %v74_v7 = vstv %s145_s0  ;;  %v58_v8 = vsel %vm48_vm4, %v56_v5, 0.0  ;;  %v59_v9 = vsel %vm49_vm8, %v56_v5, 0.0 }
  0x14   :  { %v75_v10 = vsel %vm267_vm7, %v74_v7, %v57_v6  ;;  %v92_v11 = vstv %s146_s1  ;;  %v76_v12 = vsel %vm66_vm5, %v74_v7, %v58_v8  ;;  %v77_v13 = vsel %vm67_vm9, %v74_v7, %v59_v9 }
  0x15   :  { %v93_v15 = vsel %vm268_vm15, %v92_v11, %v75_v10  ;;  %v110_v16 = vstv %s147_s19  ;;  %v94_v17 = vsel %vm84_vm6, %v92_v11, %v76_v12  ;;  %v95_v18 = vsel %vm85_vm10, %v92_v11, %v77_v13 }
  0x16   :  { %vm269_vm3 = vcmp.eq.s32.totalorder %v39_v0, 3  ;;  %vm270_vm4 = vcmp.eq.s32.totalorder %v40_v1, 3  ;;  %v113_v21 = vsel %vm103_vm11, %v110_v16, %v95_v18  ;;  %v60_v22 = vsel %vm50_vm12, %v56_v5, 0.0 }
  0x17   :  { %v111_v19 = vsel %vm269_vm3, %v110_v16, %v93_v15  ;;  %v112_v20 = vsel %vm270_vm4, %v110_v16, %v94_v17  ;;  %v78_v23 = vsel %vm68_vm13, %v74_v7, %v60_v22  ;;  %v61_v24 = vsel %vm51_vm1, %v56_v5, 0.0  ;;  %121 = vst [vmem:[#allocation7 + $0x10] sm:$0xff] %v113_v21 }
  0x18   :  { %119 = vst [vmem:[#allocation7] sm:$0xff] %v111_v19  ;;  %vm105_vm5 = vcmp.eq.s32.totalorder %v43_v4, 3  ;;  %vm52_vm7 = vcmp.eq.s32.totalorder %v44_v14, 0  ;;  %v96_v26 = vsel %vm86_vm14, %v92_v11, %v78_v23  ;;  %v79_v27 = vsel %vm69_vm2, %v74_v7, %v61_v24 }
  0x19   :  { %120 = vst [vmem:[#allocation7 + $0x8] sm:$0xff] %v112_v20  ;;  %v62_v28 = vsel %vm52_vm7, %v56_v5, 0.0  ;;  %vm70_vm6 = vcmp.eq.s32.totalorder %v44_v14, 1  ;;  %vm271_vm8 = vcmp.eq.s32.totalorder %v42_v3, 3  ;;  %v97_v30 = vsel %vm87_vm0, %v92_v11, %v79_v27 }
  0x1a   :  { %v114_v29 = vsel %vm271_vm8, %v110_v16, %v96_v26  ;;  %v80_v31 = vsel %vm70_vm6, %v74_v7, %v62_v28  ;;  %vm88_vm9 = vcmp.eq.s32.totalorder %v44_v14, 2  ;;  %v115_v33 = vsel %vm105_vm5, %v110_v16, %v97_v30 }
  0x1b   :  { %122 = vst [vmem:[#allocation7 + $0x18] sm:$0xff] %v114_v29  ;;  %v98_v34 = vsel %vm88_vm9, %v92_v11, %v80_v31  ;;  %vm106_vm1 = vcmp.eq.s32.totalorder %v44_v14, 3  ;;  %vm53_vm10 = vcmp.eq.s32.totalorder %v45_v25, 0  ;;  %vm71_vm11 = vcmp.eq.s32.totalorder %v45_v25, 1 }
  0x1c   :  { %123 = vst [vmem:[#allocation7 + $0x20] sm:$0xff] %v115_v33  ;;  %v116_v35 = vsel %vm106_vm1, %v110_v16, %v98_v34  ;;  %v63_v36 = vsel %vm53_vm10, %v56_v5, 0.0  ;;  %vm89_vm2 = vcmp.eq.s32.totalorder %v45_v25, 2  ;;  %vm107_vm12 = vcmp.eq.s32.totalorder %v45_v25, 3 }
  0x1d   :  { %124 = vst [vmem:[#allocation7 + $0x28] sm:$0xff] %v116_v35  ;;  %v81_v37 = vsel %vm71_vm11, %v74_v7, %v63_v36  ;;  %vm54_vm13 = vcmp.eq.s32.totalorder %v46_v32, 0  ;;  %vm72_vm14 = vcmp.eq.s32.totalorder %v46_v32, 1  ;;  %vm90_vm0 = vcmp.eq.s32.totalorder %v46_v32, 2 }
  0x1e   :  { %v99_v38 = vsel %vm89_vm2, %v92_v11, %v81_v37  ;;  %v64_v39 = vsel %vm54_vm13, %v56_v5, 0.0  ;;  %vm108_vm15 = vcmp.eq.s32.totalorder %v46_v32, 3 }
  0x1f   :  { %v117_v40 = vsel %vm107_vm12, %v110_v16, %v99_v38  ;;  %v82_v41 = vsel %vm72_vm14, %v74_v7, %v64_v39 }
  0x20   :  { %125 = vst [vmem:[#allocation7 + $0x30] sm:$0xff] %v117_v40  ;;  %v100_v42 = vsel %vm90_vm0, %v92_v11, %v82_v41 }
  0x21   :  { %v118_v43 = vsel %vm108_vm15, %v110_v16, %v100_v42 }
  0x22   :  { %126 = vst [vmem:[#allocation7 + $0x38] sm:$0xff] %v118_v43 }
  0x23   :  { %137 = dma.vmem_to_hbm [thread:$0]  %s133_s21, 1024, %s135_s24, [#allocation4]  }
  0x24   :  { %215 = dma.done.wait [#allocation4], 1024  }
  0x25   :  { %216 = vsyncadd [#allocation4], 4294966272 }
  0x26   :  { %142 = vsyncpa [#allocation3], 1 }
  0x27   :  { %143 = vsyncpa [#allocation4], 1 }
  0x28   :  { %144 = vsyncpa [#allocation5], 1 }

</bundles_post_ra>
